<compile_context>
chip_gen: v5e
topology: v5e:2x2
jax: 0.10.0
libtpu: 0.0.40
codegen_flags: <defaults>
</compile_context>

<pallas_src>
import functools

import jax
import jax.numpy as jnp
from jax.experimental import pallas as pl
from jax.experimental.pallas import tpu as pltpu

HIDDEN = 1024  # fc1 output width (fixed by the module)


def _round_up(x, m):
    return ((x + m - 1) // m) * m


def _pick_tile_b(n_rows):
    """Keep >= 4 grid steps when N allows: 2 pipelined steps per TensorCore on
    v7x, 3+ steps on single-TC v5e/v6e so the x prefetch hides behind compute."""
    for t in (512, 256, 128, 64, 32, 16):
        if n_rows >= 4 * t:
            return t
    return 16


def _pick_tile_k(kp):
    for t in (2048, 1024, 512, 256, 128):
        if kp % t == 0:
            return t
    return kp  # kp is always a multiple of 128, so unreachable


def _vmem_estimate(tb, tk, h, dp, out_bytes):
    return (2 * tb * tk * 4            # x f32 tile, double-buffered
            + 2 * tk * h * 2           # W1^T bf16 tile, double-buffered
            + 2 * h * dp * 2           # W2^T bf16 (conservatively counted x2)
            + 2 * tb * dp * out_bytes  # out tile, double-buffered
            + tb * h * 4)              # f32 accumulator scratch


def _shrink_tiles(tile_b, tile_k, h, dp, out_bytes, budget=32 << 20):
    """Shrink tiles (K first, then batch) until the VMEM estimate fits the budget.
    Halving preserves the multiple-of-128 / multiple-of-16 and divisibility props."""
    while _vmem_estimate(tile_b, tile_k, h, dp, out_bytes) > budget and tile_k > 512:
        tile_k //= 2
    while _vmem_estimate(tile_b, tile_k, h, dp, out_bytes) > budget and tile_b > 16:
        tile_b //= 2
    return tile_b, tile_k


def _poimlp_kernel(x_ref, w1_ref, w2_ref, o_ref, acc_ref):
    # x_ref : (TB, TK) f32    w1_ref : (TK, H) bf16
    # w2_ref: (H, Dp) bf16    o_ref  : (TB, Dp)      acc_ref: (TB, H) f32
    k = pl.program_id(1)

    @pl.when(k == 0)
    def _():
        acc_ref[...] = jnp.zeros_like(acc_ref)

    # Cast in-kernel: x is read from HBM once in f32, no pre-kernel bf16 copy.
    x_bf = x_ref[...].astype(jnp.bfloat16)
    acc_ref[...] += jnp.dot(x_bf, w1_ref[...], preferred_element_type=jnp.float32)

    @pl.when(k == pl.num_programs(1) - 1)
    def _():
        h = jnp.tanh(acc_ref[...]).astype(w2_ref.dtype)  # f32 tanh (EUP), bf16 for MXU
        y = jnp.dot(h, w2_ref[...], preferred_element_type=jnp.float32)
        o_ref[...] = y.astype(o_ref.dtype)


@functools.partial(jax.jit, static_argnames=("out_dim", "out_dtype", "tile_b"))
def poimlp_forward(x, w1_bf, w2_bf, *, out_dim, out_dtype=jnp.float32, tile_b=None):
    """x: [..., max_len_poi, llm_dim] (or already [N, K]); weights from
    prepare_params (bf16, lane-padded). Returns [N, out_dim] in out_dtype."""
    Kp, H = w1_bf.shape
    Hb, Dp = w2_bf.shape
    assert H == Hb == HIDDEN

    # torch: x.view(-1, max_len_poi * llm_dim)
    K = x.shape[-2] * x.shape[-1] if x.ndim >= 3 else x.shape[-1]
    x2d = x.reshape(-1, K)
    N = x2d.shape[0]

    if tile_b is None:
        tile_b = _pick_tile_b(N)
    assert tile_b % 16 == 0, "tile_b must be a multiple of 16 (bf16 sublane packing)"

    tile_k = _pick_tile_k(Kp)
    out_bytes = jnp.dtype(out_dtype).itemsize
    tile_b, tile_k = _shrink_tiles(tile_b, tile_k, H, Dp, out_bytes)

    # Ragged N / unaligned K: zero-pad (zero rows/cols contribute nothing,
    # tanh(0)=0; padded output rows/cols are sliced away below).
    Np = _round_up(max(N, tile_b), tile_b)
    pad_n, pad_k = Np - N, Kp - K
    if pad_n or pad_k:
        x2d = jnp.pad(x2d, ((0, pad_n), (0, pad_k)))

    grid = (Np // tile_b, Kp // tile_k)

    est = _vmem_estimate(tile_b, tile_k, H, Dp, out_bytes)
    vmem_limit = min(max(int(est * 1.5) + (2 << 20), 16 << 20), 56 << 20)

    cost = pl.CostEstimate(
        flops=2 * Np * (Kp * H + H * Dp),
        transcendentals=Np * H,
        bytes_accessed=Np * Kp * 4 + Kp * H * 2 + H * Dp * 2 + Np * Dp * out_bytes,
    )

    out = pl.pallas_call(
        _poimlp_kernel,
        out_shape=jax.ShapeDtypeStruct((Np, Dp), out_dtype),
        grid_spec=pltpu.PrefetchScalarGridSpec(
            num_scalar_prefetch=0,
            grid=grid,
            in_specs=[
                pl.BlockSpec((tile_b, tile_k), lambda i, k: (i, k)),  # x tile (f32)
                pl.BlockSpec((tile_k, H), lambda i, k: (k, 0)),       # W1^T, K-streamed
                pl.BlockSpec((H, Dp), lambda i, k: (0, 0)),           # W2^T, resident
            ],
            out_specs=pl.BlockSpec((tile_b, Dp), lambda i, k: (i, 0)),
            scratch_shapes=[pltpu.VMEM((tile_b, H), jnp.float32)],    # f32 accumulator
        ),
        compiler_params=pltpu.CompilerParams(
            dimension_semantics=("parallel", "arbitrary"),
            vmem_limit_bytes=vmem_limit,
        ),
        cost_estimate=cost,
    )(x2d, w1_bf, w2_bf)

    if Np != N or Dp != out_dim:
        out = out[:N, :out_dim]
    return out


def prepare_params(w1t, w2t):
    """One-time weight prep (call OUTSIDE the per-step path): cast to bf16 and
    zero-pad W1^T rows (K) / W2^T cols (D) to multiples of 128 lanes."""
    K, H = w1t.shape
    H2, D = w2t.shape
    assert H == H2 == HIDDEN
    Kp = _round_up(K, 128)
    Dp = _round_up(D, 128)
    w1_bf = w1t.astype(jnp.bfloat16)
    if Kp != K:
        w1_bf = jnp.pad(w1_bf, ((0, Kp - K), (0, 0)))
    w2_bf = w2t.astype(jnp.bfloat16)
    if Dp != D:
        w2_bf = jnp.pad(w2_bf, ((0, 0), (0, Dp - D)))
    return w1_bf, w2_bf, D


def init_params(key, llm_dim, max_len_poi, hidden=HIDDEN, dtype=jnp.float32):
    """Deterministic init mimicking nn.Linear (uniform(-1/sqrt(fan_in), +))."""
    k1, k2 = jax.random.split(key)
    K = max_len_poi * llm_dim
    bound1 = 1.0 / (K ** 0.5)
    bound2 = 1.0 / (hidden ** 0.5)
    # Stored already transposed: y = x @ W^T  ->  x @ w_t
    w1t = jax.random.uniform(k1, (K, hidden), dtype, -bound1, bound1)
    w2t = jax.random.uniform(k2, (hidden, llm_dim), dtype, -bound2, bound2)
    return w1t, w2t


def reference_forward_f32(x, w1t, w2t):
    K = w1t.shape[0]
    x2d = x.reshape(-1, K)
    return jnp.tanh(x2d @ w1t) @ w2t


def reference_forward_matched(x, w1t, w2t):
    """Same bf16-input / f32-accum precision path as the kernel."""
    K = w1t.shape[0]
    x2d = x.reshape(-1, K).astype(jnp.bfloat16)
    h = jnp.tanh(
        jnp.dot(x2d, w1t.astype(jnp.bfloat16), preferred_element_type=jnp.float32)
    ).astype(jnp.bfloat16)
    return jnp.dot(h, w2t.astype(jnp.bfloat16), preferred_element_type=jnp.float32)


if __name__ == "__main__":
    llm_dim = 32
    max_len_poi = 8
    batch = 10  # deliberately NOT a multiple of the tile, to exercise N padding

    key = jax.random.PRNGKey(0)
    kx, kp = jax.random.split(key)

    x = jax.random.normal(kx, (batch, max_len_poi, llm_dim), jnp.float32)
    w1t, w2t = init_params(kp, llm_dim, max_len_poi)

    # One-time weight preparation (bf16 cast + lane padding), outside the hot path.
    w1_bf, w2_bf, out_dim = prepare_params(w1t, w2t)

    out = poimlp_forward(x, w1_bf, w2_bf, out_dim=out_dim)
    out = jax.block_until_ready(out)

    assert out.shape == (batch, llm_dim), out.shape

    # Tight check against a reference using the same bf16-input precision path.
    ref_matched = reference_forward_matched(x, w1t, w2t)
    assert jnp.allclose(out, ref_matched, atol=5e-3, rtol=5e-3), \
        "mismatch vs matched-precision reference"

    # Looser check against the full-f32 PyTorch-equivalent reference.
    ref_f32 = reference_forward_f32(x, w1t, w2t)
    assert jnp.allclose(out, ref_f32, atol=5e-2, rtol=5e-2), "mismatch vs f32 reference"

    print("KERNEL_OK")
</pallas_src>

<mosaic_0001>
module attributes {stable_mosaic.version = 11 : i64} {
  func.func @_poimlp_kernel(%arg0: i32, %arg1: i32, %arg2: memref<16x256xf32, #tpu.memory_space<vmem>>, %arg3: memref<256x1024xbf16, #tpu.memory_space<vmem>>, %arg4: memref<1024x128xbf16, #tpu.memory_space<vmem>>, %arg5: memref<16x128xf32, #tpu.memory_space<vmem>>, %arg6: memref<16x1024xf32, #tpu.memory_space<vmem>>) attributes {dimension_semantics = [#tpu.dimension_semantics<parallel>, #tpu.dimension_semantics<arbitrary>], iteration_bounds = array<i64: 1, 1>, scalar_prefetch = 0 : i64, scratch_operands = 1 : i64, tpu.core_type = #tpu.core_type<tc>, window_params = [{transform_indices = @transform_0, window_bounds = array<i64: 16, 256>}, {transform_indices = @transform_1, window_bounds = array<i64: 256, 1024>}, {pipeline_mode = #tpu.pipeline_mode<synchronous>, transform_indices = @transform_2, window_bounds = array<i64: 1024, 128>}, {transform_indices = @transform_3, window_bounds = array<i64: 16, 128>}]} {
    %c0_i32 = arith.constant 0 : i32
    %0 = arith.cmpi eq, %arg1, %c0_i32 : i32
    %1 = arith.extui %0 : i1 to i32
    %c0_i32_0 = arith.constant 0 : i32
    %2 = arith.cmpi ne, %1, %c0_i32_0 : i32
    scf.if %2 {
      %cst_10 = arith.constant 0.000000e+00 : f32
      %13 = vector.broadcast %cst_10 : f32 to vector<16x1024xf32>
      %c0_11 = arith.constant 0 : index
      %c0_12 = arith.constant 0 : index
      %14 = vector.load %arg6[%c0_11, %c0_12] : memref<16x1024xf32, #tpu.memory_space<vmem>>, vector<16x1024xf32>
      tpu.vector_store %arg6[%c0_11, %c0_12], %13 {strides = array<i32>} : memref<16x1024xf32, #tpu.memory_space<vmem>>, vector<16x1024xf32>,
    } else {
    }
    %c0 = arith.constant 0 : index
    %c0_1 = arith.constant 0 : index
    %3 = vector.load %arg2[%c0, %c0_1] : memref<16x256xf32, #tpu.memory_space<vmem>>, vector<16x256xf32>
    %4 = arith.truncf %3 : vector<16x256xf32> to vector<16x256xbf16>
    %c0_2 = arith.constant 0 : index
    %c0_3 = arith.constant 0 : index
    %5 = vector.load %arg6[%c0_2, %c0_3] : memref<16x1024xf32, #tpu.memory_space<vmem>>, vector<16x1024xf32>
    %c0_4 = arith.constant 0 : index
    %c0_5 = arith.constant 0 : index
    %6 = vector.load %arg3[%c0_4, %c0_5] : memref<256x1024xbf16, #tpu.memory_space<vmem>>, vector<256x1024xbf16>
    %cst = arith.constant dense<0.000000e+00> : vector<16x1024xf32>
    %7 = tpu.matmul %4, %6, %cst {dimension_numbers = #tpu.dot_dimension_numbers<[1], [0], [0], [1], [0, 0, 1, 1], [], []>} : vector<16x256xbf16>, vector<256x1024xbf16>, vector<16x1024xf32> -> vector<16x1024xf32>
    %8 = arith.addf %5, %7 : vector<16x1024xf32>
    %c0_6 = arith.constant 0 : index
    %c0_7 = arith.constant 0 : index
    %9 = vector.load %arg6[%c0_6, %c0_7] : memref<16x1024xf32, #tpu.memory_space<vmem>>, vector<16x1024xf32>
    tpu.vector_store %arg6[%c0_6, %c0_7], %8 {strides = array<i32>} : memref<16x1024xf32, #tpu.memory_space<vmem>>, vector<16x1024xf32>,
    %c0_i32_8 = arith.constant 0 : i32
    %10 = arith.cmpi eq, %arg1, %c0_i32_8 : i32
    %11 = arith.extui %10 : i1 to i32
    %c0_i32_9 = arith.constant 0 : i32
    %12 = arith.cmpi ne, %11, %c0_i32_9 : i32
    scf.if %12 {
      %c0_10 = arith.constant 0 : index
      %c0_11 = arith.constant 0 : index
      %13 = vector.load %arg6[%c0_10, %c0_11] : memref<16x1024xf32, #tpu.memory_space<vmem>>, vector<16x1024xf32>
      %14 = math.tanh %13 : vector<16x1024xf32>
      %15 = arith.truncf %14 : vector<16x1024xf32> to vector<16x1024xbf16>
      %c0_12 = arith.constant 0 : index
      %c0_13 = arith.constant 0 : index
      %16 = vector.load %arg4[%c0_12, %c0_13] : memref<1024x128xbf16, #tpu.memory_space<vmem>>, vector<1024x128xbf16>
      %cst_14 = arith.constant dense<0.000000e+00> : vector<16x128xf32>
      %17 = tpu.matmul %15, %16, %cst_14 {dimension_numbers = #tpu.dot_dimension_numbers<[1], [0], [0], [1], [0, 0, 1, 1], [], []>} : vector<16x1024xbf16>, vector<1024x128xbf16>, vector<16x128xf32> -> vector<16x128xf32>
      %c0_15 = arith.constant 0 : index
      %c0_16 = arith.constant 0 : index
      %18 = vector.load %arg5[%c0_15, %c0_16] : memref<16x128xf32, #tpu.memory_space<vmem>>, vector<16x128xf32>
      tpu.vector_store %arg5[%c0_15, %c0_16], %17 {strides = array<i32>} : memref<16x128xf32, #tpu.memory_space<vmem>>, vector<16x128xf32>,
    } else {
    }
    return
  }
  func.func @transform_0(%arg0: i32, %arg1: i32) -> (i32, i32) {
    %c0_i32 = arith.constant 0 : i32
    return %arg0, %arg1 : i32, i32
  }
  func.func @transform_1(%arg0: i32, %arg1: i32) -> (i32, i32) {
    %c0_i32 = arith.constant 0 : i32
    %c0_i32_0 = arith.constant 0 : i32
    return %arg1, %c0_i32 : i32, i32
  }
  func.func @transform_2(%arg0: i32, %arg1: i32) -> (i32, i32) {
    %c0_i32 = arith.constant 0 : i32
    %c0_i32_0 = arith.constant 0 : i32
    %c0_i32_1 = arith.constant 0 : i32
    return %c0_i32, %c0_i32_0 : i32, i32
  }
  func.func @transform_3(%arg0: i32, %arg1: i32) -> (i32, i32) {
    %c0_i32 = arith.constant 0 : i32
    %c0_i32_0 = arith.constant 0 : i32
    return %arg0, %c0_i32 : i32, i32
  }
}

</mosaic_0001>

<bundles_post_ra>
// kernel: poimlp_forward.1
= control target key start
LH: loop header
LB: loop body
LE: loop exit
PB: predicated region body
PF: predicated region fallthrough
CT: control target
= control target key end

     0   :  { %8 = vsyncpa [#allocation4], 0  ;;  %s2951_s0 = inlined_call_operand.vmem [shape: f32[16,256], index: 0, kind: input, shape index: {}]   ;;  %s2952_s1 = inlined_call_operand.hbm [shape: bf16[256,1024], index: 1, kind: input, shape index: {}]   ;;  %s2953_s2 = inlined_call_operand.hbm [shape: bf16[1024,128], index: 2, kind: input, shape index: {}]   ;;  %s2954_s3 = inlined_call_operand.hbm [shape: f32[16,128], index: 3, kind: output, shape index: {}]  }
   0x1   :  { %9 = vsyncpa [#allocation7], 0 }
   0x2   :  { %10 = vsyncpa [#allocation5], 0  ;;  %s17_s14 = sshll.u32 %s2952_s1, 4  ;;  %s2881_s15 = smov [#allocation3]   ;;  %s18_s14 = int_to_ptr.hbm [resolvable:$true] %s17_s14 }
   0x3   :  { %s19_s16 = sshll.u32 %s2881_s15, 4  ;;  %s30_s19 = sshll.u32 %s2953_s2, 4  ;;  %s20_s16 = int_to_ptr.vmem [resolvable:$true] %s19_s16  ;;  %s31_s19 = int_to_ptr.hbm [resolvable:$true] %s30_s19 }
   0x4   :  { %s2882_s20 = smov 512   ;;  %s2883_s21 = smov 32  }
   0x5   :  { %25 = dma.hbm_to_vmem [thread:$0]  %s18_s14, 16384, %s20_s16, [#allocation4], %s2882_s20, %s2882_s20, %s2883_s21  }
   0x6   :  { %s2884_s22 = smov [#allocation6]   ;;  %s2885_s24 = smov 64  }
   0x7   :  { %s32_s23 = sshll.u32 %s2884_s22, 4  ;;  %s2886_s25 = smov 4   ;;  %s33_s23 = int_to_ptr.vmem [resolvable:$true] %s32_s23 }
   0x8   :  { %38 = dma.hbm_to_vmem [thread:$0]  %s31_s19, 8192, %s33_s23, [#allocation7], %s2885_s24, %s2885_s24, %s2886_s25  }
   0x9   :  { %2875 = dma.done.wait [#allocation4], 16384  }
   0xa   :  { %2876 = vsyncadd [#allocation4], 4294950912 }
   0xb   :  { %2877 = dma.done.wait [#allocation7], 8192  }
   0xc   :  { %2878 = vsyncadd [#allocation7], 4294959104  ;;  %v2028_v0 = vld [vmem:[#allocation3 + $0x1c0] sm:$0xf]  ;;  %v2626_v5 = vld [vmem:[#allocation3 + $0x1c4] sm:$0xf] }
   0xd   :  { %v2630_v1 = vld [vmem:[#allocation3 + $0x1dc] sm:$0xf0]  ;;  %v2030_v6 = vld [vmem:[#allocation3 + $0x1e0] sm:$0xf0]  ;;  %s1788_s8 = sshll.u32 %s2954_s3, 4  ;;  %s2888_s9 = smov 128   ;;  %s1789_s8 = int_to_ptr.hbm [resolvable:$true] %s1788_s8 }
   0xe   :  { %v2284_v2 = vld [vmem:[#allocation3 + $0x3c0] sm:$0xf]  ;;  %v2029_v3 = vor.u32 %v2630_v1, %v2028_v0  ;;  %v2033_v8 = vor.u32 %v2626_v5, %v2030_v6  ;;  %v2690_v9 = vld [vmem:[#allocation3 + $0x3c4] sm:$0xf]  ;;  %s2889_s10 = smov 8  }
   0xf   :  { %v2694_v4 = vld [vmem:[#allocation3 + $0x3dc] sm:$0xf0]  ;;  %v2286_v10 = vld [vmem:[#allocation3 + $0x3e0] sm:$0xf0] }
  0x10   :  { %v2285_v7 = vor.u32 %v2694_v4, %v2284_v2  ;;  %v1996_v11 = vld [vmem:[#allocation3 + $0x180] sm:$0xf]  ;;  %857 = vmatpush.bf16.msra.mxu0 %v2029_v3  ;;  %v2289_v12 = vor.u32 %v2690_v9, %v2286_v10  ;;  %885 = vmatpush.bf16.msra.mxu2 %v2033_v8  ;;  %v2618_v18 = vld [vmem:[#allocation3 + $0x184] sm:$0xf] }
  0x11   :  { %v2622_v13 = vld [vmem:[#allocation3 + $0x19c] sm:$0xf0]  ;;  %v1998_v19 = vld [vmem:[#allocation3 + $0x1a0] sm:$0xf0] }
  0x12   :  { %v2252_v14 = vld [vmem:[#allocation3 + $0x380] sm:$0xf]  ;;  %871 = vmatpush.bf16.msra.mxu1 %v2285_v7  ;;  %v1997_v16 = vor.u32 %v2622_v13, %v1996_v11  ;;  %v2682_v20 = vld [vmem:[#allocation3 + $0x384] sm:$0xf]  ;;  %899 = vmatpush.bf16.msra.mxu3 %v2289_v12  ;;  %v2001_v21 = vor.u32 %v2618_v18, %v1998_v19 }
  0x13   :  { %v2686_v15 = vld [vmem:[#allocation3 + $0x39c] sm:$0xf0]  ;;  %v2254_v22 = vld [vmem:[#allocation3 + $0x3a0] sm:$0xf0] }
  0x14   :  { %v2253_v17 = vor.u32 %v2686_v15, %v2252_v14  ;;  %v1964_v23 = vld [vmem:[#allocation3 + $0x140] sm:$0xf]  ;;  %v2257_v25 = vor.u32 %v2682_v20, %v2254_v22  ;;  %v2610_v28 = vld [vmem:[#allocation3 + $0x144] sm:$0xf]  ;;  %858 = vmatpush.bf16.msra.mxu0 %v1997_v16  ;;  %886 = vmatpush.bf16.msra.mxu2 %v2001_v21 }
  0x15   :  { %v2614_v24 = vld [vmem:[#allocation3 + $0x15c] sm:$0xf0]  ;;  %v1966_v30 = vld [vmem:[#allocation3 + $0x160] sm:$0xf0] }
  0x16   :  { %v2220_v26 = vld [vmem:[#allocation3 + $0x340] sm:$0xf]  ;;  %v1965_v29 = vor.u32 %v2614_v24, %v1964_v23  ;;  %v2674_v31 = vld [vmem:[#allocation3 + $0x344] sm:$0xf]  ;;  %872 = vmatpush.bf16.msra.mxu1 %v2253_v17  ;;  %v1969_v34 = vor.u32 %v2610_v28, %v1966_v30  ;;  %900 = vmatpush.bf16.msra.mxu3 %v2257_v25  ;;  %v2036_v28 = vld [vmem:[#allocation3 + $0x1c8] sm:$0xf] }
  0x17   :  { %v2678_v27 = vld [vmem:[#allocation3 + $0x35c] sm:$0xf0]  ;;  %v2222_v32 = vld [vmem:[#allocation3 + $0x360] sm:$0xf0]  ;;  %v2292_v30 = vld [vmem:[#allocation3 + $0x3c8] sm:$0xf] }
  0x18   :  { %v2221_v33 = vor.u32 %v2678_v27, %v2220_v26  ;;  %v1932_v35 = vld [vmem:[#allocation3 + $0x100] sm:$0xf]  ;;  %v2225_v38 = vor.u32 %v2674_v31, %v2222_v32  ;;  %v2602_v40 = vld [vmem:[#allocation3 + $0x104] sm:$0xf]  ;;  %859 = vmatpush.bf16.msra.mxu0 %v1965_v29  ;;  %887 = vmatpush.bf16.msra.mxu2 %v1969_v34  ;;  %v2631_v29 = vld [vmem:[#allocation3 + $0x1e4] sm:$0xf0] }
  0x19   :  { %v2606_v36 = vld [vmem:[#allocation3 + $0x11c] sm:$0xf0]  ;;  %v1934_v41 = vld [vmem:[#allocation3 + $0x120] sm:$0xf0]  ;;  %v2695_v32 = vld [vmem:[#allocation3 + $0x3e4] sm:$0xf0] }
  0x1a   :  { %v2188_v37 = vld [vmem:[#allocation3 + $0x300] sm:$0xf]  ;;  %v2666_v42 = vld [vmem:[#allocation3 + $0x304] sm:$0xf]  ;;  %v1933_v44 = vor.u32 %v2606_v36, %v1932_v35  ;;  %873 = vmatpush.bf16.msra.mxu1 %v2221_v33  ;;  %v1937_v46 = vor.u32 %v2602_v40, %v1934_v41  ;;  %901 = vmatpush.bf16.msra.mxu3 %v2225_v38  ;;  %v2627_v33 = vld [vmem:[#allocation3 + $0x1cc] sm:$0xf]  ;;  %v2037_v41 = vor.u32 %v2631_v29, %v2036_v28 }
  0x1b   :  { %v2670_v39 = vld [vmem:[#allocation3 + $0x31c] sm:$0xf0]  ;;  %v2190_v43 = vld [vmem:[#allocation3 + $0x320] sm:$0xf0]  ;;  %v2038_v34 = vld [vmem:[#allocation3 + $0x1e8] sm:$0xf0] }
  0x1c   :  { %v2189_v45 = vor.u32 %v2670_v39, %v2188_v37  ;;  %v1900_v47 = vld [vmem:[#allocation3 + $0xc0] sm:$0xf]  ;;  %v2193_v50 = vor.u32 %v2666_v42, %v2190_v43  ;;  %v2594_v52 = vld [vmem:[#allocation3 + $0xc4] sm:$0xf]  ;;  %860 = vmatpush.bf16.msra.mxu0 %v1933_v44  ;;  %888 = vmatpush.bf16.msra.mxu2 %v1937_v46  ;;  %v2691_v37 = vld [vmem:[#allocation3 + $0x3cc] sm:$0xf]  ;;  %v2041_v46 = vor.u32 %v2627_v33, %v2038_v34 }
  0x1d   :  { %v2598_v48 = vld [vmem:[#allocation3 + $0xdc] sm:$0xf0]  ;;  %v1902_v53 = vld [vmem:[#allocation3 + $0xe0] sm:$0xf0]  ;;  %v2294_v38 = vld [vmem:[#allocation3 + $0x3e8] sm:$0xf0] }
  0x1e   :  { %v2156_v49 = vld [vmem:[#allocation3 + $0x2c0] sm:$0xf]  ;;  %v2658_v54 = vld [vmem:[#allocation3 + $0x2c4] sm:$0xf]  ;;  %v1901_v56 = vor.u32 %v2598_v48, %v1900_v47  ;;  %874 = vmatpush.bf16.msra.mxu1 %v2189_v45  ;;  %v1905_v58 = vor.u32 %v2594_v52, %v1902_v53  ;;  %902 = vmatpush.bf16.msra.mxu3 %v2193_v50  ;;  %v2004_v39 = vld [vmem:[#allocation3 + $0x188] sm:$0xf]  ;;  %v2293_v45 = vor.u32 %v2695_v32, %v2292_v30 }
  0x1f   :  { %v2662_v51 = vld [vmem:[#allocation3 + $0x2dc] sm:$0xf0]  ;;  %v2158_v55 = vld [vmem:[#allocation3 + $0x2e0] sm:$0xf0]  ;;  %v2623_v42 = vld [vmem:[#allocation3 + $0x1a4] sm:$0xf0]  ;;  %v2297_v50 = vor.u32 %v2691_v37, %v2294_v38 }
  0x20   :  { %v2157_v57 = vor.u32 %v2662_v51, %v2156_v49  ;;  %v1868_v59 = vld [vmem:[#allocation3 + $0x80] sm:$0xf]  ;;  %v2161_v62 = vor.u32 %v2658_v54, %v2158_v55  ;;  %v2586_v0 = vld [vmem:[#allocation3 + $0x84] sm:$0xf]  ;;  %861 = vmatpush.bf16.msra.mxu0 %v1901_v56  ;;  %889 = vmatpush.bf16.msra.mxu2 %v1905_v58  ;;  %v69_v44 = vld [vmem:[%s2951_s0 + $0x10] sm:$0xff]  ;;  %v2005_v58 = vor.u32 %v2623_v42, %v2004_v39 }
  0x21   :  { %v2590_v60 = vld [vmem:[#allocation3 + $0x9c] sm:$0xf0]  ;;  %v1870_v1 = vld [vmem:[#allocation3 + $0xa0] sm:$0xf0]  ;;  %v2260_v47 = vld [vmem:[#allocation3 + $0x388] sm:$0xf] }
  0x22   :  { %v2124_v61 = vld [vmem:[#allocation3 + $0x280] sm:$0xf]  ;;  %v2650_v2 = vld [vmem:[#allocation3 + $0x284] sm:$0xf]  ;;  %v1869_v4 = vor.u32 %v2590_v60, %v1868_v59  ;;  %875 = vmatpush.bf16.msra.mxu1 %v2157_v57  ;;  %v1873_v6 = vor.u32 %v2586_v0, %v1870_v1  ;;  %903 = vmatpush.bf16.msra.mxu3 %v2161_v62  ;;  %v68_v48 = vld [vmem:[%s2951_s0 + $0x8] sm:$0xff] }
  0x23   :  { %v2654_v63 = vld [vmem:[#allocation3 + $0x29c] sm:$0xf0]  ;;  %v2126_v3 = vld [vmem:[#allocation3 + $0x2a0] sm:$0xf0]  ;;  %v70_v49 = vld [vmem:[%s2951_s0 + $0x18] sm:$0xff] }
  0x24   :  { %v2125_v5 = vor.u32 %v2654_v63, %v2124_v61  ;;  %v1836_v7 = vld [vmem:[#allocation3 + $0x40] sm:$0xf]  ;;  %v2129_v10 = vor.u32 %v2650_v2, %v2126_v3  ;;  %v2578_v12 = vld [vmem:[#allocation3 + $0x44] sm:$0xf]  ;;  %862 = vmatpush.bf16.msra.mxu0 %v1869_v4  ;;  %890 = vmatpush.bf16.msra.mxu2 %v1873_v6  ;;  %v2687_v51 = vld [vmem:[#allocation3 + $0x3a4] sm:$0xf0]  ;;  %v2930_v57 = vpack.c.bf16 %v70_v49, %v68_v48 }
  0x25   :  { %v2582_v8 = vld [vmem:[#allocation3 + $0x5c] sm:$0xf0]  ;;  %v1838_v13 = vld [vmem:[#allocation3 + $0x60] sm:$0xf0]  ;;  %v2619_v52 = vld [vmem:[#allocation3 + $0x18c] sm:$0xf]  ;;  %v2261_v59 = vor.u32 %v2687_v51, %v2260_v47 }
  0x26   :  { %v2092_v9 = vld [vmem:[#allocation3 + $0x240] sm:$0xf]  ;;  %v2642_v14 = vld [vmem:[#allocation3 + $0x244] sm:$0xf]  ;;  %v1837_v16 = vor.u32 %v2582_v8, %v1836_v7  ;;  %876 = vmatpush.bf16.msra.mxu1 %v2125_v5  ;;  %v1841_v20 = vor.u32 %v2578_v12, %v1838_v13  ;;  %904 = vmatpush.bf16.msra.mxu3 %v2129_v10  ;;  %v2006_v53 = vld [vmem:[#allocation3 + $0x1a8] sm:$0xf0] }
  0x27   :  { %v2646_v11 = vld [vmem:[#allocation3 + $0x25c] sm:$0xf0]  ;;  %v2094_v15 = vld [vmem:[#allocation3 + $0x260] sm:$0xf0]  ;;  %v2683_v55 = vld [vmem:[#allocation3 + $0x38c] sm:$0xf]  ;;  %v2009_v60 = vor.u32 %v2619_v52, %v2006_v53 }
  0x28   :  { %v1804_v17 = vld [vmem:[#allocation3] sm:$0xf]  ;;  %v2093_v19 = vor.u32 %v2646_v11, %v2092_v9  ;;  %v2570_v23 = vld [vmem:[#allocation3 + $0x4] sm:$0xf]  ;;  %v2097_v24 = vor.u32 %v2642_v14, %v2094_v15  ;;  %863 = vmatpush.bf16.msra.mxu0 %v1837_v16  ;;  %891 = vmatpush.bf16.msra.mxu2 %v1841_v20  ;;  %v2262_v56 = vld [vmem:[#allocation3 + $0x3a8] sm:$0xf0] }
  0x29   :  { %v2574_v18 = vld [vmem:[#allocation3 + $0x1c] sm:$0xf0]  ;;  %v1806_v25 = vld [vmem:[#allocation3 + $0x20] sm:$0xf0]  ;;  %v1972_v61 = vld [vmem:[#allocation3 + $0x148] sm:$0xf]  ;;  %v2265_v0 = vor.u32 %v2683_v55, %v2262_v56 }
  0x2a   :  { %v2060_v21 = vld [vmem:[#allocation3 + $0x200] sm:$0xf]  ;;  %v2634_v26 = vld [vmem:[#allocation3 + $0x204] sm:$0xf]  ;;  %v1805_v31 = vor.u32 %v2574_v18, %v1804_v17  ;;  %877 = vmatpush.bf16.msra.mxu1 %v2093_v19  ;;  %v1809_v36 = vor.u32 %v2570_v23, %v1806_v25  ;;  %905 = vmatpush.bf16.msra.mxu3 %v2097_v24  ;;  %v2615_v62 = vld [vmem:[#allocation3 + $0x164] sm:$0xf0] }
  0x2b   :  { %v2638_v22 = vld [vmem:[#allocation3 + $0x21c] sm:$0xf0]  ;;  %v2062_v27 = vld [vmem:[#allocation3 + $0x220] sm:$0xf0]  ;;  %v2228_v63 = vld [vmem:[#allocation3 + $0x348] sm:$0xf]  ;;  %v1973_v6 = vor.u32 %v2615_v62, %v1972_v61 }
  0x2c   :  { %v2061_v35 = vor.u32 %v2638_v22, %v2060_v21  ;;  %v2065_v40 = vor.u32 %v2634_v26, %v2062_v27  ;;  %v67_v43 = vld [vmem:[%s2951_s0] sm:$0xff]  ;;  %864 = vmatpush.bf16.msra.mxu0 %v1805_v31  ;;  %892 = vmatpush.bf16.msra.mxu2 %v1809_v36  ;;  %v2679_v1 = vld [vmem:[#allocation3 + $0x364] sm:$0xf0]  ;;  %v2611_v2 = vld [vmem:[#allocation3 + $0x14c] sm:$0xf]  ;;  %s2887_s0 = smov [#allocation8]  }
  0x2d   :  { %v2928_v54 = vpack.c.bf16 %v69_v44, %v67_v43  ;;  %v1974_v3 = vld [vmem:[#allocation3 + $0x168] sm:$0xf0]  ;;  %v2229_v7 = vor.u32 %v2679_v1, %v2228_v63  ;;  %v1940_v9 = vld [vmem:[#allocation3 + $0x108] sm:$0xf]  ;;  %s1786_s5 = sshll.u32 %s2887_s0, 4  ;;  %s1787_s5 = int_to_ptr.vmem [resolvable:$true] %s1786_s5 }
  0x2e   :  { %878 = vmatpush.bf16.msra.mxu1 %v2061_v35  ;;  %906 = vmatpush.bf16.msra.mxu3 %v2065_v40  ;;  %v2675_v4 = vld [vmem:[#allocation3 + $0x34c] sm:$0xf]  ;;  %v1977_v8 = vor.u32 %v2611_v2, %v1974_v3  ;;  %v2607_v10 = vld [vmem:[#allocation3 + $0x124] sm:$0xf0] }
  0x2f   :  { %893 = vmatmul.bf16.vlgmr.msra.gmra.mxu2 %v2928_v54  ;;  %v2230_v5 = vld [vmem:[#allocation3 + $0x368] sm:$0xf0]  ;;  %865 = vmatmul.bf16.vlgmr.msra.gmra.mxu0 %v2928_v54  ;;  %v2196_v11 = vld [vmem:[#allocation3 + $0x308] sm:$0xf]  ;;  %v1941_v18 = vor.u32 %v2607_v10, %v1940_v9  ;;  %v2628_v9 = vld [vmem:[#allocation3 + $0x1d4] sm:$0xf] }
  0x30   :  { %913 = vmatpush.bf16.msrb.mxu0 %v2037_v41  ;;  %941 = vmatpush.bf16.msrb.mxu2 %v2041_v46  ;;  %v2233_v12 = vor.u32 %v2675_v4, %v2230_v5  ;;  %v2671_v13 = vld [vmem:[#allocation3 + $0x324] sm:$0xf0]  ;;  %v2603_v14 = vld [vmem:[#allocation3 + $0x10c] sm:$0xf]  ;;  %v2044_v4 = vld [vmem:[#allocation3 + $0x1d0] sm:$0xf] }
  0x31   :  { %907 = vmatmul.bf16.vlgmr.msra.gmra.mxu3 %v2930_v57  ;;  %879 = vmatmul.bf16.vlgmr.msra.gmra.mxu1 %v2930_v57  ;;  %v1942_v15 = vld [vmem:[#allocation3 + $0x128] sm:$0xf0]  ;;  %v2197_v19 = vor.u32 %v2671_v13, %v2196_v11  ;;  %v1908_v21 = vld [vmem:[#allocation3 + $0xc8] sm:$0xf]  ;;  %v2632_v5 = vld [vmem:[#allocation3 + $0x1ec] sm:$0xf0] }
  0x32   :  { %927 = vmatpush.bf16.msrb.mxu1 %v2293_v45  ;;  %955 = vmatpush.bf16.msrb.mxu3 %v2297_v50  ;;  %v2667_v16 = vld [vmem:[#allocation3 + $0x30c] sm:$0xf]  ;;  %v1945_v20 = vor.u32 %v2603_v14, %v1942_v15  ;;  %v2599_v22 = vld [vmem:[#allocation3 + $0xe4] sm:$0xf0]  ;;  %v2046_v10 = vld [vmem:[#allocation3 + $0x1f0] sm:$0xf0] }
  0x33   :  { %v2198_v17 = vld [vmem:[#allocation3 + $0x328] sm:$0xf0]  ;;  %v2164_v23 = vld [vmem:[#allocation3 + $0x2c8] sm:$0xf]  ;;  %v1909_v30 = vor.u32 %v2599_v22, %v1908_v21  ;;  %v2692_v13 = vld [vmem:[#allocation3 + $0x3d4] sm:$0xf] }
  0x34   :  { %914 = vmatpush.bf16.msrb.mxu0 %v2005_v58  ;;  %942 = vmatpush.bf16.msrb.mxu2 %v2009_v60  ;;  %v2201_v24 = vor.u32 %v2667_v16, %v2198_v17  ;;  %v2663_v25 = vld [vmem:[#allocation3 + $0x2e4] sm:$0xf0]  ;;  %v2595_v26 = vld [vmem:[#allocation3 + $0xcc] sm:$0xf]  ;;  %v2302_v14 = vld [vmem:[#allocation3 + $0x3f0] sm:$0xf0]  ;;  %v2045_v16 = vor.u32 %v2632_v5, %v2044_v4 }
  0x35   :  { %v1910_v27 = vld [vmem:[#allocation3 + $0xe8] sm:$0xf0]  ;;  %v2165_v31 = vor.u32 %v2663_v25, %v2164_v23  ;;  %v1876_v33 = vld [vmem:[#allocation3 + $0x88] sm:$0xf]  ;;  %v2268_v21 = vld [vmem:[#allocation3 + $0x390] sm:$0xf]  ;;  %v2305_v22 = vor.u32 %v2692_v13, %v2302_v14 }
  0x36   :  { %928 = vmatpush.bf16.msrb.mxu1 %v2261_v59  ;;  %956 = vmatpush.bf16.msrb.mxu3 %v2265_v0  ;;  %v2659_v28 = vld [vmem:[#allocation3 + $0x2cc] sm:$0xf]  ;;  %v1913_v32 = vor.u32 %v2595_v26, %v1910_v27  ;;  %v2591_v34 = vld [vmem:[#allocation3 + $0xa4] sm:$0xf0]  ;;  %v2688_v23 = vld [vmem:[#allocation3 + $0x3ac] sm:$0xf0] }
  0x37   :  { %v2166_v29 = vld [vmem:[#allocation3 + $0x2e8] sm:$0xf0]  ;;  %v2132_v35 = vld [vmem:[#allocation3 + $0x288] sm:$0xf]  ;;  %v1877_v42 = vor.u32 %v2591_v34, %v1876_v33  ;;  %v2014_v25 = vld [vmem:[#allocation3 + $0x1b0] sm:$0xf0] }
  0x38   :  { %915 = vmatpush.bf16.msrb.mxu0 %v1973_v6  ;;  %943 = vmatpush.bf16.msrb.mxu2 %v1977_v8  ;;  %v2169_v36 = vor.u32 %v2659_v28, %v2166_v29  ;;  %v2655_v37 = vld [vmem:[#allocation3 + $0x2a4] sm:$0xf0]  ;;  %v2587_v38 = vld [vmem:[#allocation3 + $0x8c] sm:$0xf]  ;;  %v2300_v6 = vld [vmem:[#allocation3 + $0x3d0] sm:$0xf]  ;;  %v2269_v29 = vor.u32 %v2688_v23, %v2268_v21 }
  0x39   :  { %v1878_v39 = vld [vmem:[#allocation3 + $0xa8] sm:$0xf0]  ;;  %v2133_v43 = vor.u32 %v2655_v37, %v2132_v35  ;;  %v1844_v45 = vld [vmem:[#allocation3 + $0x48] sm:$0xf]  ;;  %v2696_v8 = vld [vmem:[#allocation3 + $0x3ec] sm:$0xf0] }
  0x3a   :  { %929 = vmatpush.bf16.msrb.mxu1 %v2229_v7  ;;  %957 = vmatpush.bf16.msrb.mxu3 %v2233_v12  ;;  %v2651_v40 = vld [vmem:[#allocation3 + $0x28c] sm:$0xf]  ;;  %v1881_v44 = vor.u32 %v2587_v38, %v1878_v39  ;;  %v2583_v46 = vld [vmem:[#allocation3 + $0x64] sm:$0xf0]  ;;  %v2301_v17 = vor.u32 %v2696_v8, %v2300_v6  ;;  %v2684_v26 = vld [vmem:[#allocation3 + $0x394] sm:$0xf] }
  0x3b   :  { %v2134_v41 = vld [vmem:[#allocation3 + $0x2a8] sm:$0xf0]  ;;  %v2100_v47 = vld [vmem:[#allocation3 + $0x248] sm:$0xf]  ;;  %v1845_v55 = vor.u32 %v2583_v46, %v1844_v45  ;;  %v2270_v27 = vld [vmem:[#allocation3 + $0x3b0] sm:$0xf0] }
  0x3c   :  { %916 = vmatpush.bf16.msrb.mxu0 %v1941_v18  ;;  %944 = vmatpush.bf16.msrb.mxu2 %v1945_v20  ;;  %v2137_v48 = vor.u32 %v2651_v40, %v2134_v41  ;;  %v2647_v49 = vld [vmem:[#allocation3 + $0x264] sm:$0xf0]  ;;  %v2579_v50 = vld [vmem:[#allocation3 + $0x4c] sm:$0xf]  ;;  %v2049_v18 = vor.u32 %v2628_v9, %v2046_v10  ;;  %v2624_v20 = vld [vmem:[#allocation3 + $0x1ac] sm:$0xf0]  ;;  %v2273_v34 = vor.u32 %v2684_v26, %v2270_v27 }
  0x3d   :  { %v1846_v51 = vld [vmem:[#allocation3 + $0x68] sm:$0xf0]  ;;  %v1812_v56 = vld [vmem:[#allocation3 + $0x8] sm:$0xf]  ;;  %v2101_v59 = vor.u32 %v2647_v49, %v2100_v47  ;;  %v2236_v33 = vld [vmem:[#allocation3 + $0x350] sm:$0xf] }
  0x3e   :  { %930 = vmatpush.bf16.msrb.mxu1 %v2197_v19  ;;  %958 = vmatpush.bf16.msrb.mxu3 %v2201_v24  ;;  %v2643_v52 = vld [vmem:[#allocation3 + $0x24c] sm:$0xf]  ;;  %v2575_v58 = vld [vmem:[#allocation3 + $0x24] sm:$0xf0]  ;;  %v1849_v60 = vor.u32 %v2579_v50, %v1846_v51  ;;  %v2012_v19 = vld [vmem:[#allocation3 + $0x190] sm:$0xf] }
  0x3f   :  { %v2102_v53 = vld [vmem:[#allocation3 + $0x268] sm:$0xf0]  ;;  %v2068_v61 = vld [vmem:[#allocation3 + $0x208] sm:$0xf]  ;;  %v1813_v7 = vor.u32 %v2575_v58, %v1812_v56  ;;  %v2620_v24 = vld [vmem:[#allocation3 + $0x194] sm:$0xf]  ;;  %v2013_v28 = vor.u32 %v2624_v20, %v2012_v19 }
  0x40   :  { %917 = vmatpush.bf16.msrb.mxu0 %v1909_v30  ;;  %945 = vmatpush.bf16.msrb.mxu2 %v1913_v32  ;;  %v2639_v62 = vld [vmem:[#allocation3 + $0x224] sm:$0xf0]  ;;  %v2571_v63 = vld [vmem:[#allocation3 + $0xc] sm:$0xf]  ;;  %v2105_v0 = vor.u32 %v2643_v52, %v2102_v53  ;;  %v2017_v30 = vor.u32 %v2620_v24, %v2014_v25  ;;  %v2616_v32 = vld [vmem:[#allocation3 + $0x16c] sm:$0xf0] }
  0x41   :  { %v1814_v1 = vld [vmem:[#allocation3 + $0x28] sm:$0xf0]  ;;  %v2069_v11 = vor.u32 %v2639_v62, %v2068_v61  ;;  %v2680_v35 = vld [vmem:[#allocation3 + $0x36c] sm:$0xf0]  ;;  %v1982_v37 = vld [vmem:[#allocation3 + $0x170] sm:$0xf0] }
  0x42   :  { %931 = vmatpush.bf16.msrb.mxu1 %v2165_v31  ;;  %959 = vmatpush.bf16.msrb.mxu3 %v2169_v36  ;;  %v2635_v2 = vld [vmem:[#allocation3 + $0x20c] sm:$0xf]  ;;  %v1817_v12 = vor.u32 %v2571_v63, %v1814_v1  ;;  %v1980_v31 = vld [vmem:[#allocation3 + $0x150] sm:$0xf]  ;;  %v2612_v36 = vld [vmem:[#allocation3 + $0x154] sm:$0xf]  ;;  %v2237_v41 = vor.u32 %v2680_v35, %v2236_v33 }
  0x43   :  { %v2070_v3 = vld [vmem:[#allocation3 + $0x228] sm:$0xf0]  ;;  %v2676_v38 = vld [vmem:[#allocation3 + $0x354] sm:$0xf]  ;;  %v1981_v40 = vor.u32 %v2616_v32, %v1980_v31  ;;  %v2204_v45 = vld [vmem:[#allocation3 + $0x310] sm:$0xf] }
  0x44   :  { %918 = vmatpush.bf16.msrb.mxu0 %v1877_v42  ;;  %946 = vmatpush.bf16.msrb.mxu2 %v1881_v44  ;;  %v2073_v15 = vor.u32 %v2635_v2, %v2070_v3  ;;  %v2238_v39 = vld [vmem:[#allocation3 + $0x370] sm:$0xf0]  ;;  %v1985_v42 = vor.u32 %v2612_v36, %v1982_v37  ;;  %v2608_v44 = vld [vmem:[#allocation3 + $0x12c] sm:$0xf0] }
  0x45   :  { %v2241_v46 = vor.u32 %v2676_v38, %v2238_v39  ;;  %v2672_v47 = vld [vmem:[#allocation3 + $0x32c] sm:$0xf0]  ;;  %v1950_v49 = vld [vmem:[#allocation3 + $0x130] sm:$0xf0]  ;;  %v2052_v38 = vld [vmem:[#allocation3 + $0x1d8] sm:$0xf] }
  0x46   :  { %932 = vmatpush.bf16.msrb.mxu1 %v2133_v43  ;;  %960 = vmatpush.bf16.msrb.mxu3 %v2137_v48  ;;  %v1948_v43 = vld [vmem:[#allocation3 + $0x110] sm:$0xf]  ;;  %v2604_v48 = vld [vmem:[#allocation3 + $0x114] sm:$0xf]  ;;  %v2205_v53 = vor.u32 %v2672_v47, %v2204_v45  ;;  %v2633_v39 = vld [vmem:[#allocation3 + $0x1f4] sm:$0xf0] }
  0x47   :  { %v2668_v50 = vld [vmem:[#allocation3 + $0x314] sm:$0xf]  ;;  %v1949_v52 = vor.u32 %v2608_v44, %v1948_v43  ;;  %v1916_v56 = vld [vmem:[#allocation3 + $0xd0] sm:$0xf]  ;;  %v2629_v43 = vld [vmem:[#allocation3 + $0x1dc] sm:$0xf] }
  0x48   :  { %919 = vmatpush.bf16.msrb.mxu0 %v1845_v55  ;;  %947 = vmatpush.bf16.msrb.mxu2 %v1849_v60  ;;  %v2206_v51 = vld [vmem:[#allocation3 + $0x330] sm:$0xf0]  ;;  %v1953_v55 = vor.u32 %v2604_v48, %v1950_v49  ;;  %v2600_v58 = vld [vmem:[#allocation3 + $0xec] sm:$0xf0]  ;;  %v2054_v44 = vld [vmem:[#allocation3 + $0x1f8] sm:$0xf0] }
  0x49   :  { %v2209_v60 = vor.u32 %v2668_v50, %v2206_v51  ;;  %v2664_v61 = vld [vmem:[#allocation3 + $0x2ec] sm:$0xf0]  ;;  %v2596_v62 = vld [vmem:[#allocation3 + $0xd4] sm:$0xf]  ;;  %v1917_v2 = vor.u32 %v2600_v58, %v1916_v56  ;;  %v2693_v47 = vld [vmem:[#allocation3 + $0x3dc] sm:$0xf]  ;;  %v2053_v50 = vor.u32 %v2633_v39, %v2052_v38 }
  0x4a   :  { %933 = vmatpush.bf16.msrb.mxu1 %v2101_v59  ;;  %961 = vmatpush.bf16.msrb.mxu3 %v2105_v0  ;;  %v2172_v59 = vld [vmem:[#allocation3 + $0x2d0] sm:$0xf]  ;;  %v1918_v63 = vld [vmem:[#allocation3 + $0xf0] sm:$0xf0]  ;;  %v2310_v48 = vld [vmem:[#allocation3 + $0x3f8] sm:$0xf0] }
  0x4b   :  { %v2660_v0 = vld [vmem:[#allocation3 + $0x2d4] sm:$0xf]  ;;  %v2173_v3 = vor.u32 %v2664_v61, %v2172_v59  ;;  %v1921_v4 = vor.u32 %v2596_v62, %v1918_v63  ;;  %v1884_v5 = vld [vmem:[#allocation3 + $0x90] sm:$0xf]  ;;  %v2276_v56 = vld [vmem:[#allocation3 + $0x398] sm:$0xf]  ;;  %v2313_v58 = vor.u32 %v2693_v47, %v2310_v48 }
  0x4c   :  { %920 = vmatpush.bf16.msrb.mxu0 %v1813_v7  ;;  %948 = vmatpush.bf16.msrb.mxu2 %v1817_v12  ;;  %v2174_v1 = vld [vmem:[#allocation3 + $0x2f0] sm:$0xf0]  ;;  %v2592_v6 = vld [vmem:[#allocation3 + $0xac] sm:$0xf0]  ;;  %v2689_v59 = vld [vmem:[#allocation3 + $0x3b4] sm:$0xf0] }
  0x4d   :  { %v2140_v7 = vld [vmem:[#allocation3 + $0x290] sm:$0xf]  ;;  %v2177_v8 = vor.u32 %v2660_v0, %v2174_v1  ;;  %v2588_v10 = vld [vmem:[#allocation3 + $0x94] sm:$0xf]  ;;  %v1885_v14 = vor.u32 %v2592_v6, %v1884_v5  ;;  %v2022_v61 = vld [vmem:[#allocation3 + $0x1b8] sm:$0xf0]  ;;  %v2277_v1 = vor.u32 %v2689_v59, %v2276_v56 }
  0x4e   :  { %934 = vmatpush.bf16.msrb.mxu1 %v2069_v11  ;;  %962 = vmatpush.bf16.msrb.mxu3 %v2073_v15  ;;  %v2656_v9 = vld [vmem:[#allocation3 + $0x2ac] sm:$0xf0]  ;;  %v1886_v11 = vld [vmem:[#allocation3 + $0xb0] sm:$0xf0]  ;;  %v2685_v62 = vld [vmem:[#allocation3 + $0x39c] sm:$0xf] }
  0x4f   :  { %921 = vmatmul.bf16.vlgmr.msrb.gmra.mxu0 %v2928_v54  ;;  %949 = vmatmul.bf16.vlgmr.msrb.gmra.mxu2 %v2928_v54  ;;  %v2652_v12 = vld [vmem:[#allocation3 + $0x294] sm:$0xf]  ;;  %v2141_v15 = vor.u32 %v2656_v9, %v2140_v7  ;;  %v2108_v19 = vld [vmem:[#allocation3 + $0x250] sm:$0xf]  ;;  %v2278_v63 = vld [vmem:[#allocation3 + $0x3b8] sm:$0xf0] }
  0x50   :  { %969 = vmatpush.bf16.msra.mxu0 %v2045_v16  ;;  %997 = vmatpush.bf16.msra.mxu2 %v2049_v18  ;;  %v2142_v13 = vld [vmem:[#allocation3 + $0x2b0] sm:$0xf0]  ;;  %v1889_v16 = vor.u32 %v2588_v10, %v1886_v11  ;;  %v2584_v18 = vld [vmem:[#allocation3 + $0x6c] sm:$0xf0]  ;;  %v2244_v5 = vld [vmem:[#allocation3 + $0x358] sm:$0xf]  ;;  %v2281_v6 = vor.u32 %v2685_v62, %v2278_v63 }
  0x51   :  { %935 = vmatmul.bf16.vlgmr.msrb.gmra.mxu1 %v2930_v57  ;;  %963 = vmatmul.bf16.vlgmr.msrb.gmra.mxu3 %v2930_v57  ;;  %v2145_v20 = vor.u32 %v2652_v12, %v2142_v13  ;;  %v2648_v21 = vld [vmem:[#allocation3 + $0x26c] sm:$0xf0]  ;;  %v1854_v23 = vld [vmem:[#allocation3 + $0x70] sm:$0xf0]  ;;  %v2681_v7 = vld [vmem:[#allocation3 + $0x374] sm:$0xf0] }
  0x52   :  { %983 = vmatpush.bf16.msra.mxu1 %v2301_v17  ;;  %1011 = vmatpush.bf16.msra.mxu3 %v2305_v22  ;;  %v1852_v17 = vld [vmem:[#allocation3 + $0x50] sm:$0xf]  ;;  %v2580_v22 = vld [vmem:[#allocation3 + $0x54] sm:$0xf]  ;;  %v1990_v9 = vld [vmem:[#allocation3 + $0x178] sm:$0xf0]  ;;  %v2245_v13 = vor.u32 %v2681_v7, %v2244_v5 }
  0x53   :  { %v2644_v24 = vld [vmem:[#allocation3 + $0x254] sm:$0xf]  ;;  %v1853_v26 = vor.u32 %v2584_v18, %v1852_v17  ;;  %v1820_v27 = vld [vmem:[#allocation3 + $0x10] sm:$0xf]  ;;  %v2677_v10 = vld [vmem:[#allocation3 + $0x35c] sm:$0xf] }
  0x54   :  { %970 = vmatpush.bf16.msra.mxu0 %v2013_v28  ;;  %998 = vmatpush.bf16.msra.mxu2 %v2017_v30  ;;  %v2110_v25 = vld [vmem:[#allocation3 + $0x270] sm:$0xf0]  ;;  %v2576_v28 = vld [vmem:[#allocation3 + $0x2c] sm:$0xf0]  ;;  %v1857_v30 = vor.u32 %v2580_v22, %v1854_v23  ;;  %v2246_v11 = vld [vmem:[#allocation3 + $0x378] sm:$0xf0] }
  0x55   :  { %v2076_v31 = vld [vmem:[#allocation3 + $0x210] sm:$0xf]  ;;  %v2572_v33 = vld [vmem:[#allocation3 + $0x14] sm:$0xf]  ;;  %v2212_v17 = vld [vmem:[#allocation3 + $0x318] sm:$0xf]  ;;  %v2249_v18 = vor.u32 %v2677_v10, %v2246_v11 }
  0x56   :  { %984 = vmatpush.bf16.msra.mxu1 %v2269_v29  ;;  %1012 = vmatpush.bf16.msra.mxu3 %v2273_v34  ;;  %v2109_v29 = vor.u32 %v2648_v21, %v2108_v19  ;;  %v2640_v32 = vld [vmem:[#allocation3 + $0x22c] sm:$0xf0]  ;;  %v2113_v34 = vor.u32 %v2644_v24, %v2110_v25  ;;  %v1822_v35 = vld [vmem:[#allocation3 + $0x30] sm:$0xf0]  ;;  %v2673_v19 = vld [vmem:[#allocation3 + $0x334] sm:$0xf0] }
  0x57   :  { %v2636_v36 = vld [vmem:[#allocation3 + $0x214] sm:$0xf]  ;;  %v2077_v45 = vor.u32 %v2640_v32, %v2076_v31  ;;  %v1958_v21 = vld [vmem:[#allocation3 + $0x138] sm:$0xf0]  ;;  %v2213_v25 = vor.u32 %v2673_v19, %v2212_v17  ;;  %v2665_v31 = vld [vmem:[#allocation3 + $0x2f4] sm:$0xf0] }
  0x58   :  { %971 = vmatpush.bf16.msra.mxu0 %v1981_v40  ;;  %999 = vmatpush.bf16.msra.mxu2 %v1985_v42  ;;  %v2078_v37 = vld [vmem:[#allocation3 + $0x230] sm:$0xf0]  ;;  %v2308_v40 = vld [vmem:[#allocation3 + $0x3d8] sm:$0xf]  ;;  %v2669_v22 = vld [vmem:[#allocation3 + $0x31c] sm:$0xf] }
  0x59   :  { %v2697_v42 = vld [vmem:[#allocation3 + $0x3f4] sm:$0xf0]  ;;  %v2081_v49 = vor.u32 %v2636_v36, %v2078_v37  ;;  %v2214_v23 = vld [vmem:[#allocation3 + $0x338] sm:$0xf0]  ;;  %v2712_v17 = vld [vmem:[#allocation6 + $0x70] sm:$0xff] }
  0x5a   :  { %985 = vmatpush.bf16.msra.mxu1 %v2237_v41  ;;  %1013 = vmatpush.bf16.msra.mxu3 %v2241_v46  ;;  %v1821_v41 = vor.u32 %v2576_v28, %v1820_v27  ;;  %v1825_v46 = vor.u32 %v2572_v33, %v1822_v35  ;;  %v2309_v51 = vor.u32 %v2697_v42, %v2308_v40  ;;  %v1924_v27 = vld [vmem:[#allocation3 + $0xd8] sm:$0xf]  ;;  %v2597_v32 = vld [vmem:[#allocation3 + $0xdc] sm:$0xf]  ;;  %v2711_v19 = vld [vmem:[#allocation6 + $0x68] sm:$0xff] }
  0x5b   :  { %v2601_v28 = vld [vmem:[#allocation3 + $0xf4] sm:$0xf0]  ;;  %v1926_v33 = vld [vmem:[#allocation3 + $0xf8] sm:$0xf0] }
  0x5c   :  { %972 = vmatpush.bf16.msra.mxu0 %v1949_v52  ;;  %1000 = vmatpush.bf16.msra.mxu2 %v1953_v55  ;;  %v2057_v52 = vor.u32 %v2629_v43, %v2054_v44  ;;  %v2625_v55 = vld [vmem:[#allocation3 + $0x1b4] sm:$0xf0]  ;;  %v2182_v35 = vld [vmem:[#allocation3 + $0x2f8] sm:$0xf0]  ;;  %v1925_v36 = vor.u32 %v2601_v28, %v1924_v27  ;;  %v1929_v38 = vor.u32 %v2597_v32, %v1926_v33  ;;  %v2719_v27 = vld [vmem:[#allocation6 + $0xa8] sm:$0xff] }
  0x5d   :  { %v1892_v39 = vld [vmem:[#allocation3 + $0x98] sm:$0xf]  ;;  %v2589_v44 = vld [vmem:[#allocation3 + $0x9c] sm:$0xf]  ;;  %v2699_v28 = vld [vmem:[#allocation6 + $0x8] sm:$0xff] }
  0x5e   :  { %986 = vmatpush.bf16.msra.mxu1 %v2205_v53  ;;  %1014 = vmatpush.bf16.msra.mxu3 %v2209_v60  ;;  %v2020_v53 = vld [vmem:[#allocation3 + $0x198] sm:$0xf]  ;;  %v2621_v60 = vld [vmem:[#allocation3 + $0x19c] sm:$0xf] }
  0x5f   :  { %v2021_v0 = vor.u32 %v2625_v55, %v2020_v53  ;;  %v2593_v40 = vld [vmem:[#allocation3 + $0xb4] sm:$0xf0]  ;;  %v2150_v47 = vld [vmem:[#allocation3 + $0x2b8] sm:$0xf0] }
  0x60   :  { %973 = vmatpush.bf16.msra.mxu0 %v1917_v2  ;;  %1001 = vmatpush.bf16.msra.mxu2 %v1921_v4  ;;  %v2025_v2 = vor.u32 %v2621_v60, %v2022_v61  ;;  %v2617_v4 = vld [vmem:[#allocation3 + $0x174] sm:$0xf0]  ;;  %v1893_v48 = vor.u32 %v2593_v40, %v1892_v39  ;;  %v1862_v59 = vld [vmem:[#allocation3 + $0x78] sm:$0xf0]  ;;  %v2726_v39 = vld [vmem:[#allocation6 + $0xe0] sm:$0xff] }
  0x61   :  { %v2657_v43 = vld [vmem:[#allocation3 + $0x2b4] sm:$0xf0]  ;;  %v2645_v60 = vld [vmem:[#allocation3 + $0x25c] sm:$0xf] }
  0x62   :  { %987 = vmatpush.bf16.msra.mxu1 %v2173_v3  ;;  %1015 = vmatpush.bf16.msra.mxu3 %v2177_v8  ;;  %v1988_v3 = vld [vmem:[#allocation3 + $0x158] sm:$0xf]  ;;  %v2613_v8 = vld [vmem:[#allocation3 + $0x15c] sm:$0xf] }
  0x63   :  { %v1989_v12 = vor.u32 %v2617_v4, %v1988_v3  ;;  %v2116_v53 = vld [vmem:[#allocation3 + $0x258] sm:$0xf]  ;;  %v2118_v61 = vld [vmem:[#allocation3 + $0x278] sm:$0xf0] }
  0x64   :  { %974 = vmatpush.bf16.msra.mxu0 %v1885_v14  ;;  %1002 = vmatpush.bf16.msra.mxu2 %v1889_v16  ;;  %v1993_v14 = vor.u32 %v2613_v8, %v1990_v9  ;;  %v2609_v16 = vld [vmem:[#allocation3 + $0x134] sm:$0xf0]  ;;  %v2121_v4 = vor.u32 %v2645_v60, %v2118_v61  ;;  %v1830_v7 = vld [vmem:[#allocation3 + $0x38] sm:$0xf0]  ;;  %v2736_v60 = vld [vmem:[#allocation6 + $0x130] sm:$0xff] }
  0x65   :  { %v2649_v56 = vld [vmem:[#allocation3 + $0x274] sm:$0xf0]  ;;  %v2637_v8 = vld [vmem:[#allocation3 + $0x21c] sm:$0xf] }
  0x66   :  { %988 = vmatpush.bf16.msra.mxu1 %v2141_v15  ;;  %1016 = vmatpush.bf16.msra.mxu3 %v2145_v20  ;;  %v1956_v15 = vld [vmem:[#allocation3 + $0x118] sm:$0xf]  ;;  %v2605_v20 = vld [vmem:[#allocation3 + $0x11c] sm:$0xf]  ;;  %v2117_v63 = vor.u32 %v2649_v56, %v2116_v53  ;;  %v2714_v53 = vld [vmem:[#allocation6 + $0x80] sm:$0xff] }
  0x67   :  { %v1957_v24 = vor.u32 %v2609_v16, %v1956_v15  ;;  %v2084_v3 = vld [vmem:[#allocation3 + $0x218] sm:$0xf]  ;;  %v2086_v9 = vld [vmem:[#allocation3 + $0x238] sm:$0xf0]  ;;  %v2704_v16 = vld [vmem:[#allocation6 + $0x30] sm:$0xff] }
  0x68   :  { %975 = vmatpush.bf16.msra.mxu0 %v1853_v26  ;;  %1003 = vmatpush.bf16.msra.mxu2 %v1857_v30  ;;  %v1961_v26 = vor.u32 %v2605_v20, %v1958_v21  ;;  %v2217_v30 = vor.u32 %v2669_v22, %v2214_v23  ;;  %v2641_v5 = vld [vmem:[#allocation3 + $0x234] sm:$0xf0]  ;;  %v2702_v20 = vld [vmem:[#allocation6 + $0x20] sm:$0xff] }
  0x69   :  { %v2085_v11 = vor.u32 %v2641_v5, %v2084_v3  ;;  %v2713_v15 = vld [vmem:[#allocation6 + $0x78] sm:$0xff]  ;;  %v2710_v21 = vld [vmem:[#allocation6 + $0x60] sm:$0xff]  ;;  %v2735_v3 = vld [vmem:[#allocation6 + $0x128] sm:$0xff] }
  0x6a   :  { %989 = vmatpush.bf16.msra.mxu1 %v2109_v29  ;;  %1017 = vmatpush.bf16.msra.mxu3 %v2113_v34  ;;  %v2180_v29 = vld [vmem:[#allocation3 + $0x2d8] sm:$0xf]  ;;  %v2661_v34 = vld [vmem:[#allocation3 + $0x2dc] sm:$0xf]  ;;  %v2734_v5 = vld [vmem:[#allocation6 + $0x120] sm:$0xff] }
  0x6b   :  { %v2181_v37 = vor.u32 %v2665_v31, %v2180_v29  ;;  %v2185_v42 = vor.u32 %v2661_v34, %v2182_v35  ;;  %v2721_v22 = vld [vmem:[#allocation6 + $0xb8] sm:$0xff]  ;;  %v2707_v29 = vld [vmem:[#allocation6 + $0x48] sm:$0xff]  ;;  %v2718_v31 = vld [vmem:[#allocation6 + $0xa0] sm:$0xff] }
  0x6c   :  { %976 = vmatpush.bf16.msra.mxu0 %v1821_v41  ;;  %1004 = vmatpush.bf16.msra.mxu2 %v1825_v46  ;;  %v2148_v41 = vld [vmem:[#allocation3 + $0x298] sm:$0xf]  ;;  %v2653_v46 = vld [vmem:[#allocation3 + $0x29c] sm:$0xf]  ;;  %v2698_v34 = vld [vmem:[#allocation6] sm:$0xff] }
  0x6d   :  { %v2153_v55 = vor.u32 %v2653_v46, %v2150_v47  ;;  %v2701_v23 = vld [vmem:[#allocation6 + $0x18] sm:$0xff]  ;;  %v2706_v35 = vld [vmem:[#allocation6 + $0x40] sm:$0xff]  ;;  %v2715_v46 = vld [vmem:[#allocation6 + $0x88] sm:$0xff] }
  0x6e   :  { %990 = vmatpush.bf16.msra.mxu1 %v2077_v45  ;;  %1018 = vmatpush.bf16.msra.mxu3 %v2081_v49  ;;  %v1894_v45 = vld [vmem:[#allocation3 + $0xb8] sm:$0xf0]  ;;  %v2149_v49 = vor.u32 %v2657_v43, %v2148_v41 }
  0x6f   :  { %977 = vmatmul.bf16.vlgmr.msra.gmra.mxu0 %v2928_v54  ;;  %1005 = vmatmul.bf16.vlgmr.msra.gmra.mxu2 %v2928_v54  ;;  %v2737_v56 = vld [vmem:[#allocation6 + $0x138] sm:$0xff] }
  0x70   :  { %1025 = vmatpush.bf16.msrb.mxu0 %v2053_v50  ;;  %1053 = vmatpush.bf16.msrb.mxu2 %v2057_v52  ;;  %v1897_v50 = vor.u32 %v2589_v44, %v1894_v45  ;;  %v2585_v52 = vld [vmem:[#allocation3 + $0x74] sm:$0xf0] }
  0x71   :  { %991 = vmatmul.bf16.vlgmr.msra.gmra.mxu1 %v2930_v57  ;;  %1019 = vmatmul.bf16.vlgmr.msra.gmra.mxu3 %v2930_v57  ;;  %v2725_v45 = vld [vmem:[#allocation6 + $0xd8] sm:$0xff] }
  0x72   :  { %1039 = vmatpush.bf16.msrb.mxu1 %v2309_v51  ;;  %1067 = vmatpush.bf16.msrb.mxu3 %v2313_v58  ;;  %v1860_v51 = vld [vmem:[#allocation3 + $0x58] sm:$0xf]  ;;  %v2581_v58 = vld [vmem:[#allocation3 + $0x5c] sm:$0xf] }
  0x73   :  { %v1861_v62 = vor.u32 %v2585_v52, %v1860_v51  ;;  %v2745_v61 = vld [vmem:[#allocation6 + $0x178] sm:$0xff] }
  0x74   :  { %1026 = vmatpush.bf16.msrb.mxu0 %v2021_v0  ;;  %1054 = vmatpush.bf16.msrb.mxu2 %v2025_v2  ;;  %v1865_v0 = vor.u32 %v2581_v58, %v1862_v59  ;;  %v2577_v2 = vld [vmem:[#allocation3 + $0x34] sm:$0xf0]  ;;  %v2723_v58 = vld [vmem:[#allocation6 + $0xc8] sm:$0xff] }
  0x76   :  { %1040 = vmatpush.bf16.msrb.mxu1 %v2277_v1  ;;  %1068 = vmatpush.bf16.msrb.mxu3 %v2281_v6  ;;  %v1828_v1 = vld [vmem:[#allocation3 + $0x18] sm:$0xf]  ;;  %v2573_v6 = vld [vmem:[#allocation3 + $0x1c] sm:$0xf] }
  0x77   :  { %v1829_v10 = vor.u32 %v2577_v2, %v1828_v1 }
  0x78   :  { %1027 = vmatpush.bf16.msrb.mxu0 %v1989_v12  ;;  %1055 = vmatpush.bf16.msrb.mxu2 %v1993_v14  ;;  %v1833_v12 = vor.u32 %v2573_v6, %v1830_v7  ;;  %v2705_v14 = vld [vmem:[#allocation6 + $0x38] sm:$0xff] }
  0x7a   :  { %1041 = vmatpush.bf16.msrb.mxu1 %v2245_v13  ;;  %1069 = vmatpush.bf16.msrb.mxu3 %v2249_v18  ;;  %v2089_v13 = vor.u32 %v2637_v8, %v2086_v9  ;;  %v2703_v18 = vld [vmem:[#allocation6 + $0x28] sm:$0xff]  ;;  %v2733_v9 = vld [vmem:[#allocation6 + $0x118] sm:$0xff] }
  0x7b   :  { %v2743_v8 = vld [vmem:[#allocation6 + $0x168] sm:$0xff] }
  0x7c   :  { %1028 = vmatpush.bf16.msrb.mxu0 %v1957_v24  ;;  %1056 = vmatpush.bf16.msrb.mxu2 %v1961_v26  ;;  %v2709_v24 = vld [vmem:[#allocation6 + $0x58] sm:$0xff] }
  0x7d   :  { %v2729_v26 = vld [vmem:[#allocation6 + $0xf8] sm:$0xff] }
  0x7e   :  { %1042 = vmatpush.bf16.msrb.mxu1 %v2213_v25  ;;  %1070 = vmatpush.bf16.msrb.mxu3 %v2217_v30  ;;  %v2720_v25 = vld [vmem:[#allocation6 + $0xb0] sm:$0xff] }
  0x7f   :  { %v2728_v30 = vld [vmem:[#allocation6 + $0xf0] sm:$0xff] }
  0x80   :  { %1029 = vmatpush.bf16.msrb.mxu0 %v1925_v36  ;;  %1057 = vmatpush.bf16.msrb.mxu2 %v1929_v38  ;;  %v2727_v36 = vld [vmem:[#allocation6 + $0xe8] sm:$0xff] }
  0x82   :  { %1043 = vmatpush.bf16.msrb.mxu1 %v2181_v37  ;;  %1071 = vmatpush.bf16.msrb.mxu3 %v2185_v42  ;;  %v2717_v37 = vld [vmem:[#allocation6 + $0x98] sm:$0xff]  ;;  %v2716_v42 = vld [vmem:[#allocation6 + $0x90] sm:$0xff] }
  0x84   :  { %1030 = vmatpush.bf16.msrb.mxu0 %v1893_v48  ;;  %1058 = vmatpush.bf16.msrb.mxu2 %v1897_v50  ;;  %v2724_v50 = vld [vmem:[#allocation6 + $0xd0] sm:$0xff] }
  0x86   :  { %1044 = vmatpush.bf16.msrb.mxu1 %v2149_v49  ;;  %1072 = vmatpush.bf16.msrb.mxu3 %v2153_v55 }
  0x88   :  { %1031 = vmatpush.bf16.msrb.mxu0 %v1861_v62  ;;  %1059 = vmatpush.bf16.msrb.mxu2 %v1865_v0 }
  0x8a   :  { %1045 = vmatpush.bf16.msrb.mxu1 %v2117_v63  ;;  %1073 = vmatpush.bf16.msrb.mxu3 %v2121_v4  ;;  %v2722_v63 = vld [vmem:[#allocation6 + $0xc0] sm:$0xff]  ;;  %v2744_v4 = vld [vmem:[#allocation6 + $0x170] sm:$0xff] }
  0x8c   :  { %1032 = vmatpush.bf16.msrb.mxu0 %v1829_v10  ;;  %1060 = vmatpush.bf16.msrb.mxu2 %v1833_v12  ;;  %v2742_v10 = vld [vmem:[#allocation6 + $0x160] sm:$0xff] }
  0x8e   :  { %1046 = vmatpush.bf16.msrb.mxu1 %v2085_v11  ;;  %1074 = vmatpush.bf16.msrb.mxu3 %v2089_v13  ;;  %v2732_v13 = vld [vmem:[#allocation6 + $0x110] sm:$0xff] }
  0x8f   :  { %1033 = vmatmul.bf16.vlgmr.msrb.gmra.mxu0 %v2928_v54  ;;  %1061 = vmatmul.bf16.vlgmr.msrb.gmra.mxu2 %v2928_v54  ;;  %v2700_v54 = vld [vmem:[#allocation6 + $0x10] sm:$0xff] }
  0x90   :  { %1668 = vmatpush.bf16.msra.mxu0 %v2705_v14  ;;  %1696 = vmatpush.bf16.msra.mxu2 %v2721_v22 }
  0x91   :  { %1047 = vmatmul.bf16.vlgmr.msrb.gmra.mxu1 %v2930_v57  ;;  %1075 = vmatmul.bf16.vlgmr.msrb.gmra.mxu3 %v2930_v57  ;;  %v2708_v57 = vld [vmem:[#allocation6 + $0x50] sm:$0xff] }
  0x92   :  { %1682 = vmatpush.bf16.msra.mxu1 %v2713_v15  ;;  %1710 = vmatpush.bf16.msra.mxu3 %v2729_v26  ;;  %v2739_v26 = vld [vmem:[#allocation6 + $0x148] sm:$0xff] }
  0x94   :  { %1669 = vmatpush.bf16.msra.mxu0 %v2704_v16  ;;  %1697 = vmatpush.bf16.msra.mxu2 %v2720_v25 }
  0x96   :  { %1683 = vmatpush.bf16.msra.mxu1 %v2712_v17  ;;  %1711 = vmatpush.bf16.msra.mxu3 %v2728_v30  ;;  %v2741_v17 = vld [vmem:[#allocation6 + $0x158] sm:$0xff]  ;;  %v2738_v30 = vld [vmem:[#allocation6 + $0x140] sm:$0xff] }
  0x98   :  { %1670 = vmatpush.bf16.msra.mxu0 %v2703_v18  ;;  %1698 = vmatpush.bf16.msra.mxu2 %v2719_v27 }
  0x9a   :  { %1684 = vmatpush.bf16.msra.mxu1 %v2711_v19  ;;  %1712 = vmatpush.bf16.msra.mxu3 %v2727_v36  ;;  %v2731_v19 = vld [vmem:[#allocation6 + $0x108] sm:$0xff]  ;;  %v2760_v36 = vld [vmem:[#allocation6 + $0x1f0] sm:$0xff] }
  0x9c   :  { %1671 = vmatpush.bf16.msra.mxu0 %v2702_v20  ;;  %1699 = vmatpush.bf16.msra.mxu2 %v2718_v31  ;;  %v2761_v31 = vld [vmem:[#allocation6 + $0x1f8] sm:$0xff] }
  0x9e   :  { %1685 = vmatpush.bf16.msra.mxu1 %v2710_v21  ;;  %1713 = vmatpush.bf16.msra.mxu3 %v2726_v39  ;;  %v2740_v21 = vld [vmem:[#allocation6 + $0x150] sm:$0xff]  ;;  %v2759_v39 = vld [vmem:[#allocation6 + $0x1e8] sm:$0xff] }
  0xa0   :  { %1672 = vmatpush.bf16.msra.mxu0 %v2701_v23  ;;  %1700 = vmatpush.bf16.msra.mxu2 %v2717_v37  ;;  %v2730_v23 = vld [vmem:[#allocation6 + $0x100] sm:$0xff] }
  0xa1   :  { %v2750_v37 = vld [vmem:[#allocation6 + $0x1a0] sm:$0xff] }
  0xa2   :  { %1686 = vmatpush.bf16.msra.mxu1 %v2709_v24  ;;  %1714 = vmatpush.bf16.msra.mxu3 %v2725_v45 }
  0xa4   :  { %1673 = vmatpush.bf16.msra.mxu0 %v2700_v54  ;;  %1701 = vmatpush.bf16.msra.mxu2 %v2716_v42  ;;  %v2753_v54 = vld [vmem:[#allocation6 + $0x1b8] sm:$0xff]  ;;  %v2758_v42 = vld [vmem:[#allocation6 + $0x1e0] sm:$0xff] }
  0xa6   :  { %1687 = vmatpush.bf16.msra.mxu1 %v2708_v57  ;;  %1715 = vmatpush.bf16.msra.mxu3 %v2724_v50  ;;  %v2747_v50 = vld [vmem:[#allocation6 + $0x188] sm:$0xff] }
  0xa8   :  { %1674 = vmatpush.bf16.msra.mxu0 %v2699_v28  ;;  %1702 = vmatpush.bf16.msra.mxu2 %v2715_v46 }
  0xaa   :  { %1688 = vmatpush.bf16.msra.mxu1 %v2707_v29  ;;  %1716 = vmatpush.bf16.msra.mxu3 %v2723_v58  ;;  %v2752_v29 = vld [vmem:[#allocation6 + $0x1b0] sm:$0xff] }
  0xac   :  { %v866_v32 = vpop.f32.mrf.mxu0  ;;  %1675 = vmatpush.bf16.msra.mxu0 %v2698_v34  ;;  %1703 = vmatpush.bf16.msra.mxu2 %v2714_v53 }
  0xae   :  { %v880_v33 = vpop.f32.mrf.mxu1  ;;  %1689 = vmatpush.bf16.msra.mxu1 %v2706_v35  ;;  %1717 = vmatpush.bf16.msra.mxu3 %v2722_v63 }
  0xaf   :  { %v881_v40 = vadd.f32 %v880_v33, %v866_v32  ;;  %v2751_v33 = vld [vmem:[#allocation6 + $0x1a8] sm:$0xff] }
  0xb0   :  { %1724 = vmatpush.bf16.msrb.mxu0 %v2737_v56  ;;  %1752 = vmatpush.bf16.msrb.mxu2 %v2753_v54 }
  0xb1   :  { %2771 = vtanh.f32 %v881_v40 }
  0xb2   :  { %v894_v38 = vpop.f32.mrf.mxu2  ;;  %1738 = vmatpush.bf16.msrb.mxu1 %v2745_v61  ;;  %1766 = vmatpush.bf16.msrb.mxu3 %v2761_v31 }
  0xb4   :  { %v908_v41 = vpop.f32.mrf.mxu3  ;;  %v868_v43 = vpop.f32.mrf.mxu0  ;;  %1725 = vmatpush.bf16.msrb.mxu0 %v2736_v60  ;;  %1753 = vmatpush.bf16.msrb.mxu2 %v2752_v29  ;;  %v2755_v60 = vld [vmem:[#allocation6 + $0x1c8] sm:$0xff] }
  0xb5   :  { %v909_v48 = vadd.f32 %v908_v41, %v894_v38  ;;  %v2749_v41 = vld [vmem:[#allocation6 + $0x198] sm:$0xff] }
  0xb6   :  { %v882_v44 = vpop.f32.mrf.mxu1  ;;  %1739 = vmatpush.bf16.msrb.mxu1 %v2744_v4  ;;  %1767 = vmatpush.bf16.msrb.mxu3 %v2760_v36 }
  0xb7   :  { %v883_v47 = vadd.f32 %v882_v44, %v868_v43  ;;  %v2772_v55 = vpop.eup %2771  ;;  %v2748_v44 = vld [vmem:[#allocation6 + $0x190] sm:$0xff] }
  0xb8   :  { %1726 = vmatpush.bf16.msrb.mxu0 %v2735_v3  ;;  %1754 = vmatpush.bf16.msrb.mxu2 %v2751_v33 }
  0xb9   :  { %2773 = vtanh.f32 %v883_v47 }
  0xba   :  { %v896_v49 = vpop.f32.mrf.mxu2  ;;  %2775 = vtanh.f32 %v909_v48  ;;  %1740 = vmatpush.bf16.msrb.mxu1 %v2743_v8  ;;  %1768 = vmatpush.bf16.msrb.mxu3 %v2759_v39  ;;  %v2757_v48 = vld [vmem:[#allocation6 + $0x1d8] sm:$0xff] }
  0xbc   :  { %v910_v51 = vpop.f32.mrf.mxu3  ;;  %1727 = vmatpush.bf16.msrb.mxu0 %v2734_v5  ;;  %1755 = vmatpush.bf16.msrb.mxu2 %v2750_v37 }
  0xbd   :  { %v911_v52 = vadd.f32 %v910_v51, %v896_v49 }
  0xbe   :  { %1741 = vmatpush.bf16.msrb.mxu1 %v2742_v10  ;;  %1769 = vmatpush.bf16.msrb.mxu3 %v2758_v42 }
  0xbf   :  { %2777 = vtanh.f32 %v911_v52  ;;  %v2774_v59 = vpop.eup %2773  ;;  %v2756_v52 = vld [vmem:[#allocation6 + $0x1d0] sm:$0xff] }
  0xc0   :  { %v1148_v62 = vpack.c.bf16 %v2774_v59, %v2772_v55  ;;  %v2776_v0 = vpop.eup %2775  ;;  %1728 = vmatpush.bf16.msrb.mxu0 %v2733_v9  ;;  %1756 = vmatpush.bf16.msrb.mxu2 %v2749_v41  ;;  %v2746_v55 = vld [vmem:[#allocation6 + $0x180] sm:$0xff] }
  0xc2   :  { %1676 = vmatmul.bf16.vlgmr.msra.gmra.mxu0 %v1148_v62  ;;  %1742 = vmatpush.bf16.msrb.mxu1 %v2741_v17 }
  0xc3   :  { %1770 = vmatpush.bf16.msrb.mxu3 %v2757_v48 }
  0xc4   :  { %1729 = vmatpush.bf16.msrb.mxu0 %v2732_v13  ;;  %1757 = vmatpush.bf16.msrb.mxu2 %v2748_v44 }
  0xc5   :  { %v2778_v1 = vpop.eup %2777 }
  0xc6   :  { %v1149_v2 = vpack.c.bf16 %v2778_v1, %v2776_v0  ;;  %1743 = vmatpush.bf16.msrb.mxu1 %v2740_v21  ;;  %v2754_v0 = vld [vmem:[#allocation6 + $0x1c0] sm:$0xff] }
  0xc7   :  { %1771 = vmatpush.bf16.msrb.mxu3 %v2756_v52 }
  0xc8   :  { %1690 = vmatmul.bf16.vlgmr.msra.gmra.mxu1 %v1149_v2  ;;  %1730 = vmatpush.bf16.msrb.mxu0 %v2731_v19 }
  0xc9   :  { %1758 = vmatpush.bf16.msrb.mxu2 %v2747_v50 }
  0xca   :  { %1744 = vmatpush.bf16.msrb.mxu1 %v2739_v26 }
  0xcb   :  { %1772 = vmatpush.bf16.msrb.mxu3 %v2755_v60 }
  0xcc   :  { %v922_v6 = vpop.f32.mrf.mxu0  ;;  %1731 = vmatpush.bf16.msrb.mxu0 %v2730_v23 }
  0xcd   :  { %1759 = vmatpush.bf16.msrb.mxu2 %v2746_v55 }
  0xce   :  { %v936_v7 = vpop.f32.mrf.mxu1  ;;  %1745 = vmatpush.bf16.msrb.mxu1 %v2738_v30 }
  0xcf   :  { %v937_v11 = vadd.f32 %v936_v7, %v922_v6  ;;  %1773 = vmatpush.bf16.msrb.mxu3 %v2754_v0 }
  0xd1   :  { %2779 = vtanh.f32 %v937_v11 }
  0xd2   :  { %v950_v12 = vpop.f32.mrf.mxu2 }
  0xd4   :  { %v964_v14 = vpop.f32.mrf.mxu3  ;;  %v924_v15 = vpop.f32.mrf.mxu0 }
  0xd5   :  { %v965_v20 = vadd.f32 %v964_v14, %v950_v12 }
  0xd6   :  { %v938_v16 = vpop.f32.mrf.mxu1 }
  0xd7   :  { %v939_v18 = vadd.f32 %v938_v16, %v924_v15  ;;  %v2780_v24 = vpop.eup %2779 }
  0xd9   :  { %2781 = vtanh.f32 %v939_v18 }
  0xda   :  { %v952_v22 = vpop.f32.mrf.mxu2  ;;  %2783 = vtanh.f32 %v965_v20 }
  0xdc   :  { %v966_v25 = vpop.f32.mrf.mxu3 }
  0xdd   :  { %v967_v57 = vadd.f32 %v966_v25, %v952_v22 }
  0xdf   :  { %v2782_v27 = vpop.eup %2781  ;;  %2785 = vtanh.f32 %v967_v57 }
  0xe0   :  { %v1150_v28 = vpack.c.bf16 %v2782_v27, %v2780_v24  ;;  %v2784_v32 = vpop.eup %2783 }
  0xe2   :  { %1704 = vmatmul.bf16.vlgmr.msra.gmra.mxu2 %v1150_v28 }
  0xe5   :  { %v2786_v34 = vpop.eup %2785 }
  0xe6   :  { %v1151_v35 = vpack.c.bf16 %v2786_v34, %v2784_v32 }
  0xe8   :  { %1718 = vmatmul.bf16.vlgmr.msra.gmra.mxu3 %v1151_v35 }
  0xec   :  { %v978_v38 = vpop.f32.mrf.mxu0 }
  0xee   :  { %v992_v40 = vpop.f32.mrf.mxu1 }
  0xef   :  { %v993_v43 = vadd.f32 %v992_v40, %v978_v38 }
  0xf1   :  { %2787 = vtanh.f32 %v993_v43 }
  0xf2   :  { %v1006_v45 = vpop.f32.mrf.mxu2 }
  0xf4   :  { %v1020_v46 = vpop.f32.mrf.mxu3  ;;  %v980_v47 = vpop.f32.mrf.mxu0 }
  0xf5   :  { %v1021_v53 = vadd.f32 %v1020_v46, %v1006_v45 }
  0xf6   :  { %v994_v49 = vpop.f32.mrf.mxu1 }
  0xf7   :  { %v995_v51 = vadd.f32 %v994_v49, %v980_v47  ;;  %v2788_v58 = vpop.eup %2787 }
  0xf9   :  { %2789 = vtanh.f32 %v995_v51 }
  0xfa   :  { %v1008_v56 = vpop.f32.mrf.mxu2  ;;  %2791 = vtanh.f32 %v1021_v53 }
  0xfc   :  { %v1022_v59 = vpop.f32.mrf.mxu3 }
  0xfd   :  { %v1023_v61 = vadd.f32 %v1022_v59, %v1008_v56 }
  0xff   :  { %v2790_v62 = vpop.eup %2789  ;;  %2793 = vtanh.f32 %v1023_v61 }
 0x100   :  { %v1152_v63 = vpack.c.bf16 %v2790_v62, %v2788_v58  ;;  %v2792_v1 = vpop.eup %2791 }
 0x102   :  { %1732 = vmatmul.bf16.vlgmr.msrb.gmra.mxu0 %v1152_v63 }
 0x105   :  { %v2794_v2 = vpop.eup %2793 }
 0x106   :  { %v1153_v3 = vpack.c.bf16 %v2794_v2, %v2792_v1 }
 0x108   :  { %1746 = vmatmul.bf16.vlgmr.msrb.gmra.mxu1 %v1153_v3 }
 0x10c   :  { %v1034_v4 = vpop.f32.mrf.mxu0 }
 0x10e   :  { %v1048_v5 = vpop.f32.mrf.mxu1 }
 0x10f   :  { %v1049_v6 = vadd.f32 %v1048_v5, %v1034_v4 }
 0x111   :  { %2795 = vtanh.f32 %v1049_v6 }
 0x112   :  { %v1062_v7 = vpop.f32.mrf.mxu2 }
 0x114   :  { %v1076_v8 = vpop.f32.mrf.mxu3  ;;  %v1036_v9 = vpop.f32.mrf.mxu0 }
 0x115   :  { %v1077_v12 = vadd.f32 %v1076_v8, %v1062_v7 }
 0x116   :  { %v1050_v10 = vpop.f32.mrf.mxu1 }
 0x117   :  { %v1051_v11 = vadd.f32 %v1050_v10, %v1036_v9  ;;  %v2796_v15 = vpop.eup %2795 }
 0x119   :  { %2797 = vtanh.f32 %v1051_v11 }
 0x11a   :  { %v1064_v13 = vpop.f32.mrf.mxu2  ;;  %2799 = vtanh.f32 %v1077_v12 }
 0x11c   :  { %v1078_v14 = vpop.f32.mrf.mxu3 }
 0x11d   :  { %v1079_v16 = vadd.f32 %v1078_v14, %v1064_v13 }
 0x11f   :  { %v2798_v17 = vpop.eup %2797  ;;  %2801 = vtanh.f32 %v1079_v16 }
 0x120   :  { %v1154_v18 = vpack.c.bf16 %v2798_v17, %v2796_v15  ;;  %v2800_v19 = vpop.eup %2799 }
 0x122   :  { %1760 = vmatmul.bf16.vlgmr.msrb.gmra.mxu2 %v1154_v18 }
 0x125   :  { %v2802_v20 = vpop.eup %2801 }
 0x126   :  { %v1155_v21 = vpack.c.bf16 %v2802_v20, %v2800_v19 }
 0x128   :  { %1774 = vmatmul.bf16.vlgmr.msrb.gmra.mxu3 %v1155_v21 }
 0x13f   :  { %v1677_v22 = vpop.f32.mrf.mxu0 }
 0x145   :  { %v1691_v23 = vpop.f32.mrf.mxu1 }
 0x146   :  { %v1692_v27 = vadd.f32 %v1691_v23, %v1677_v22 }
 0x147   :  { %v1679_v25 = vpop.f32.mrf.mxu0 }
 0x14d   :  { %v1693_v57 = vpop.f32.mrf.mxu1 }
 0x14e   :  { %v1694_v35 = vadd.f32 %v1693_v57, %v1679_v25 }
 0x165   :  { %v1705_v24 = vpop.f32.mrf.mxu2 }
 0x166   :  { %v1706_v29 = vadd.f32 %v1705_v24, %v1692_v27 }
 0x16b   :  { %v1719_v54 = vpop.f32.mrf.mxu3 }
 0x16c   :  { %v1720_v32 = vadd.f32 %v1719_v54, %v1706_v29 }
 0x16d   :  { %v1707_v26 = vpop.f32.mrf.mxu2 }
 0x16e   :  { %v1708_v37 = vadd.f32 %v1707_v26, %v1694_v35 }
 0x173   :  { %v1721_v30 = vpop.f32.mrf.mxu3 }
 0x174   :  { %v1722_v41 = vadd.f32 %v1721_v30, %v1708_v37 }
 0x17f   :  { %v1733_v28 = vpop.f32.mrf.mxu0 }
 0x180   :  { %v1734_v34 = vadd.f32 %v1733_v28, %v1720_v32 }
 0x185   :  { %v1747_v31 = vpop.f32.mrf.mxu1 }
 0x186   :  { %v1748_v36 = vadd.f32 %v1747_v31, %v1734_v34 }
 0x187   :  { %v1735_v39 = vpop.f32.mrf.mxu0 }
 0x188   :  { %v1736_v44 = vadd.f32 %v1735_v39, %v1722_v41 }
 0x18d   :  { %v1749_v43 = vpop.f32.mrf.mxu1 }
 0x18e   :  { %v1750_v46 = vadd.f32 %v1749_v43, %v1736_v44 }
 0x1a5   :  { %v1761_v33 = vpop.f32.mrf.mxu2 }
 0x1a6   :  { %v1762_v38 = vadd.f32 %v1761_v33, %v1748_v36 }
 0x1ab   :  { %v1775_v40 = vpop.f32.mrf.mxu3 }
 0x1ac   :  { %v1776_v42 = vadd.f32 %v1775_v40, %v1762_v38 }
 0x1ad   :  { %v1763_v45 = vpop.f32.mrf.mxu2 }
 0x1ae   :  { %1780 = vst [vmem:[#allocation8] sm:$0xff] %v1776_v42  ;;  %v1764_v47 = vadd.f32 %v1763_v45, %v1750_v46 }
 0x1b3   :  { %v1777_v48 = vpop.f32.mrf.mxu3 }
 0x1b4   :  { %v1778_v49 = vadd.f32 %v1777_v48, %v1764_v47 }
 0x1b6   :  { %1781 = vst [vmem:[#allocation8 + $0x8] sm:$0xff] %v1778_v49 }
 0x1b7   :  { %1794 = dma.vmem_to_hbm [thread:$0]  %s1787_s5, 256, %s1789_s8, [#allocation5], %s2888_s9, %s2888_s9, %s2889_s10  }
 0x1b8   :  { %2879 = dma.done.wait [#allocation5], 256  }
 0x1b9   :  { %2880 = vsyncadd [#allocation5], 4294967040 }
 0x1ba   :  { %1799 = vsyncpa [#allocation4], 1 }
 0x1bb   :  { %1800 = vsyncpa [#allocation7], 1 }
 0x1bc   :  { %1801 = vsyncpa [#allocation5], 1 }

</bundles_post_ra>
